<compile_context>
chip_gen: v5e
topology: v5e:2x2
jax: 0.10.0
libtpu: 0.0.40
codegen_flags: <defaults>
</compile_context>

<pallas_src>
import functools
import math

import jax
import jax.numpy as jnp
from jax import lax
from jax.experimental import pallas as pl
from jax.experimental.pallas import tpu as pltpu


def _mha_kernel(q_ref, k_ref, v_ref,
                wq_ref, bq_ref, wk_ref, bk_ref, wv_ref, bv_ref,
                wo_ref, bo_ref,
                o_ref, acc_ref, *, num_heads, d_k):
    j = pl.program_id(1)  # head index

    @pl.when(j == 0)
    def _():
        acc_ref[...] = jnp.zeros_like(acc_ref)

    # Per-head input projections: (S, D) @ (D, d_k), contraction depth = D.
    # Operands bf16, accumulation f32; f32 bias broadcast over seq.
    qh = jnp.dot(q_ref[...], wq_ref[...],
                 preferred_element_type=jnp.float32) + bq_ref[...]
    kh = jnp.dot(k_ref[...], wk_ref[...],
                 preferred_element_type=jnp.float32) + bk_ref[...]
    vh = jnp.dot(v_ref[...], wv_ref[...],
                 preferred_element_type=jnp.float32) + bv_ref[...]

    # scores = (Q @ K^T) / sqrt(d_k); transpose absorbed via dot_general
    # contracting dim 1 of both operands (no XLU transpose).
    scores = lax.dot_general(
        qh.astype(jnp.bfloat16), kh.astype(jnp.bfloat16),
        dimension_numbers=(((1,), (1,)), ((), ())),
        preferred_element_type=jnp.float32) * (1.0 / math.sqrt(d_k))

    # Numerically-stable softmax along keys, kept in f32; divide on the EUP.
    m = jnp.max(scores, axis=-1, keepdims=True)
    e = jnp.exp(scores - m)
    p = e * pl.reciprocal(jnp.sum(e, axis=-1, keepdims=True), approx=True)

    # (S, S) @ (S, d_k): contraction depth = S.
    pv = jnp.dot(p.astype(jnp.bfloat16), vh.astype(jnp.bfloat16),
                 preferred_element_type=jnp.float32)

    # Output projection accumulated per head (no concat, bounded vreg pressure):
    # out += head_out @ Wo[rows of this head].
    acc_ref[...] += jnp.dot(pv.astype(jnp.bfloat16), wo_ref[...],
                            preferred_element_type=jnp.float32)

    @pl.when(j == num_heads - 1)
    def _():
        # Single lane-dense (S, D) store.
        o_ref[...] = (acc_ref[...] + bo_ref[...]).astype(o_ref.dtype)


def _vmem_budget(S, D, d_k, out_bytes=4):
    """Explicit VMEM budget (double-buffered tiles + f32 accumulator), with headroom."""
    est = (3 * 2 * S * D * 2                       # q/k/v bf16, double-buffered
           + (3 * D * d_k + d_k * D) * 2 * 2       # per-head weight slabs, bf16, 2x
           + (3 * d_k + D) * 2 * 4                 # biases f32, 2x
           + 2 * S * D * out_bytes                 # output tile, 2x
           + S * D * 4)                            # f32 accumulator scratch
    return int(min(max(2 * est, 32 * 1024 * 1024), 64 * 1024 * 1024))


def multi_headed_attention(query, key, value, params, *, h):
    """Fused MHA forward. query/key/value: (B, S, D)."""
    B, S, D = query.shape
    assert D % h == 0
    d_k = D // h
    wq, bq, wk, bk, wv, bv, wo, bo = params

    # Host-side re-layout of weights into per-head slabs (done once, outside
    # the kernel).  Head i owns columns [i*d_k, (i+1)*d_k) of Wq/Wk/Wv and
    # rows [i*d_k, (i+1)*d_k) of Wo.
    def split_cols(w):   # (D, D) -> (h, D, d_k), bf16 MXU operands
        return w.reshape(D, h, d_k).transpose(1, 0, 2).astype(jnp.bfloat16)

    def split_bias(b):   # (D,) -> (h, 1, d_k), f32
        return b.reshape(h, 1, d_k).astype(jnp.float32)

    wq_h, wk_h, wv_h = split_cols(wq), split_cols(wk), split_cols(wv)
    bq_h, bk_h, bv_h = split_bias(bq), split_bias(bk), split_bias(bv)
    wo_h = wo.reshape(h, d_k, D).astype(jnp.bfloat16)
    bo_r = bo.reshape(1, D).astype(jnp.float32)

    # bf16 activations (halves HBM traffic / VMEM); accumulation stays f32.
    q_bf = query.astype(jnp.bfloat16)
    k_bf = key.astype(jnp.bfloat16)
    v_bf = value.astype(jnp.bfloat16)

    kernel = functools.partial(_mha_kernel, num_heads=h, d_k=d_k)

    # Leading batch / head dims squeezed out of the kernel refs (block dim None).
    seq_spec = pl.BlockSpec((None, S, D), lambda b, j: (b, 0, 0))   # resident across heads
    w_in_spec = pl.BlockSpec((None, D, d_k), lambda b, j: (j, 0, 0))
    b_in_spec = pl.BlockSpec((None, 1, d_k), lambda b, j: (j, 0, 0))
    wo_spec = pl.BlockSpec((None, d_k, D), lambda b, j: (j, 0, 0))
    bo_spec = pl.BlockSpec((1, D), lambda b, j: (0, 0))

    grid_spec = pltpu.PrefetchScalarGridSpec(
        num_scalar_prefetch=0,
        grid=(B, h),
        in_specs=[seq_spec, seq_spec, seq_spec,
                  w_in_spec, b_in_spec,   # Wq, bq
                  w_in_spec, b_in_spec,   # Wk, bk
                  w_in_spec, b_in_spec,   # Wv, bv
                  wo_spec, bo_spec],      # Wo, bo
        out_specs=pl.BlockSpec((None, S, D), lambda b, j: (b, 0, 0)),
        scratch_shapes=[pltpu.VMEM((S, D), jnp.float32)],
    )

    return pl.pallas_call(
        kernel,
        out_shape=jax.ShapeDtypeStruct((B, S, D), query.dtype),
        grid_spec=grid_spec,
        compiler_params=pltpu.CompilerParams(
            dimension_semantics=("parallel", "arbitrary"),
            vmem_limit_bytes=_vmem_budget(S, D, d_k)),
    )(q_bf, k_bf, v_bf, wq_h, bq_h, wk_h, bk_h, wv_h, bv_h, wo_h, bo_r)


def _reference_mha(query, key, value, params, *, h):
    """Pure-JAX f32 reference mirroring the PyTorch forward (eval mode, no mask)."""
    B, S, D = query.shape
    d_k = D // h
    wq, bq, wk, bk, wv, bv, wo, bo = params

    def proj(x, w, b):
        return (x @ w + b).reshape(B, S, h, d_k).transpose(0, 2, 1, 3)  # (B, h, S, d_k)

    q = proj(query, wq, bq)
    k = proj(key, wk, bk)
    v = proj(value, wv, bv)

    scores = jnp.einsum("bhqd,bhkd->bhqk", q, k) / math.sqrt(d_k)
    p = jax.nn.softmax(scores, axis=-1)
    x = jnp.einsum("bhqk,bhkd->bhqd", p, v)
    x = x.transpose(0, 2, 1, 3).reshape(B, S, D)
    return x @ wo + bo


if __name__ == "__main__":
    B, S, d_model, h = 2, 8, 32, 4

    key0 = jax.random.PRNGKey(0)
    keys = jax.random.split(key0, 12)

    # Deterministic synthetic parameters (nn.Linear-style uniform init).
    bound = 1.0 / math.sqrt(d_model)

    def uni(k, shape):
        return jax.random.uniform(k, shape, jnp.float32, minval=-bound, maxval=bound)

    params = (
        uni(keys[0], (d_model, d_model)), uni(keys[1], (d_model,)),   # Wq, bq
        uni(keys[2], (d_model, d_model)), uni(keys[3], (d_model,)),   # Wk, bk
        uni(keys[4], (d_model, d_model)), uni(keys[5], (d_model,)),   # Wv, bv
        uni(keys[6], (d_model, d_model)), uni(keys[7], (d_model,)),   # Wo, bo
    )

    query = jax.random.normal(keys[8], (B, S, d_model), jnp.float32)
    key_in = jax.random.normal(keys[9], (B, S, d_model), jnp.float32)
    value = jax.random.normal(keys[10], (B, S, d_model), jnp.float32)

    out = multi_headed_attention(query, key_in, value, params, h=h)
    out = jax.block_until_ready(out)

    ref = _reference_mha(query, key_in, value, params, h=h)
    assert out.shape == (B, S, d_model)
    # Tolerance accounts for bf16 matmul operands / approx reciprocal in-kernel
    # (accumulation and softmax statistics are f32).
    assert jnp.allclose(out, ref, atol=3e-2, rtol=3e-2), "mismatch vs reference"

    print("KERNEL_OK")
</pallas_src>

<mosaic_0001>
module attributes {stable_mosaic.version = 11 : i64} {
  func.func @_mha_kernel(%arg0: i32, %arg1: i32, %arg2: memref<1x8x32xbf16, #tpu.memory_space<vmem>>, %arg3: memref<1x8x32xbf16, #tpu.memory_space<vmem>>, %arg4: memref<1x8x32xbf16, #tpu.memory_space<vmem>>, %arg5: memref<1x32x8xbf16, #tpu.memory_space<vmem>>, %arg6: memref<1x1x8xf32, #tpu.memory_space<vmem>>, %arg7: memref<1x32x8xbf16, #tpu.memory_space<vmem>>, %arg8: memref<1x1x8xf32, #tpu.memory_space<vmem>>, %arg9: memref<1x32x8xbf16, #tpu.memory_space<vmem>>, %arg10: memref<1x1x8xf32, #tpu.memory_space<vmem>>, %arg11: memref<1x8x32xbf16, #tpu.memory_space<vmem>>, %arg12: memref<1x32xf32, #tpu.memory_space<vmem>>, %arg13: memref<1x8x32xf32, #tpu.memory_space<vmem>>, %arg14: memref<8x32xf32, #tpu.memory_space<vmem>>) attributes {dimension_semantics = [#tpu.dimension_semantics<parallel>, #tpu.dimension_semantics<arbitrary>], iteration_bounds = array<i64: 2, 4>, scalar_prefetch = 0 : i64, scratch_operands = 1 : i64, tpu.core_type = #tpu.core_type<tc>, window_params = [{transform_indices = @transform_0, window_bounds = array<i64: 1, 8, 32>}, {transform_indices = @transform_1, window_bounds = array<i64: 1, 8, 32>}, {transform_indices = @transform_2, window_bounds = array<i64: 1, 8, 32>}, {transform_indices = @transform_3, window_bounds = array<i64: 1, 32, 8>}, {transform_indices = @transform_4, window_bounds = array<i64: 1, 1, 8>}, {transform_indices = @transform_5, window_bounds = array<i64: 1, 32, 8>}, {transform_indices = @transform_6, window_bounds = array<i64: 1, 1, 8>}, {transform_indices = @transform_7, window_bounds = array<i64: 1, 32, 8>}, {transform_indices = @transform_8, window_bounds = array<i64: 1, 1, 8>}, {transform_indices = @transform_9, window_bounds = array<i64: 1, 8, 32>}, {pipeline_mode = #tpu.pipeline_mode<synchronous>, transform_indices = @transform_10, window_bounds = array<i64: 1, 32>}, {transform_indices = @transform_11, window_bounds = array<i64: 1, 8, 32>}]} {
    %c0_i32 = arith.constant 0 : i32
    %0 = arith.cmpi eq, %arg1, %c0_i32 : i32
    %1 = arith.extui %0 : i1 to i32
    %c0_i32_0 = arith.constant 0 : i32
    %2 = arith.cmpi ne, %1, %c0_i32_0 : i32
    scf.if %2 {
      %cst_43 = arith.constant 0.000000e+00 : f32
      %58 = vector.broadcast %cst_43 : f32 to vector<8x32xf32>
      %c0_44 = arith.constant 0 : index
      %c0_45 = arith.constant 0 : index
      %59 = vector.load %arg14[%c0_44, %c0_45] : memref<8x32xf32, #tpu.memory_space<vmem>>, vector<8x32xf32>
      tpu.vector_store %arg14[%c0_44, %c0_45], %58 {strides = array<i32>} : memref<8x32xf32, #tpu.memory_space<vmem>>, vector<8x32xf32>,
    } else {
    }
    %c0 = arith.constant 0 : index
    %c0_1 = arith.constant 0 : index
    %c0_2 = arith.constant 0 : index
    %3 = vector.load %arg2[%c0, %c0_1, %c0_2] : memref<1x8x32xbf16, #tpu.memory_space<vmem>>, vector<1x8x32xbf16>
    %4 = vector.shape_cast %3 : vector<1x8x32xbf16> to vector<8x32xbf16>
    %c0_3 = arith.constant 0 : index
    %c0_4 = arith.constant 0 : index
    %c0_5 = arith.constant 0 : index
    %5 = vector.load %arg5[%c0_3, %c0_4, %c0_5] : memref<1x32x8xbf16, #tpu.memory_space<vmem>>, vector<1x32x8xbf16>
    %6 = vector.shape_cast %5 : vector<1x32x8xbf16> to vector<32x8xbf16>
    %cst = arith.constant dense<0.000000e+00> : vector<8x8xf32>
    %7 = tpu.matmul %4, %6, %cst {dimension_numbers = #tpu.dot_dimension_numbers<[1], [0], [0], [1], [0, 0, 1, 1], [], []>} : vector<8x32xbf16>, vector<32x8xbf16>, vector<8x8xf32> -> vector<8x8xf32>
    %c0_6 = arith.constant 0 : index
    %c0_7 = arith.constant 0 : index
    %c0_8 = arith.constant 0 : index
    %8 = vector.load %arg6[%c0_6, %c0_7, %c0_8] : memref<1x1x8xf32, #tpu.memory_space<vmem>>, vector<1x1x8xf32>
    %9 = vector.shape_cast %8 : vector<1x1x8xf32> to vector<1x8xf32>
    %10 = vector.broadcast %9 : vector<1x8xf32> to vector<8x8xf32>
    %11 = arith.addf %7, %10 : vector<8x8xf32>
    %c0_9 = arith.constant 0 : index
    %c0_10 = arith.constant 0 : index
    %c0_11 = arith.constant 0 : index
    %12 = vector.load %arg3[%c0_9, %c0_10, %c0_11] : memref<1x8x32xbf16, #tpu.memory_space<vmem>>, vector<1x8x32xbf16>
    %13 = vector.shape_cast %12 : vector<1x8x32xbf16> to vector<8x32xbf16>
    %c0_12 = arith.constant 0 : index
    %c0_13 = arith.constant 0 : index
    %c0_14 = arith.constant 0 : index
    %14 = vector.load %arg7[%c0_12, %c0_13, %c0_14] : memref<1x32x8xbf16, #tpu.memory_space<vmem>>, vector<1x32x8xbf16>
    %15 = vector.shape_cast %14 : vector<1x32x8xbf16> to vector<32x8xbf16>
    %cst_15 = arith.constant dense<0.000000e+00> : vector<8x8xf32>
    %16 = tpu.matmul %13, %15, %cst_15 {dimension_numbers = #tpu.dot_dimension_numbers<[1], [0], [0], [1], [0, 0, 1, 1], [], []>} : vector<8x32xbf16>, vector<32x8xbf16>, vector<8x8xf32> -> vector<8x8xf32>
    %c0_16 = arith.constant 0 : index
    %c0_17 = arith.constant 0 : index
    %c0_18 = arith.constant 0 : index
    %17 = vector.load %arg8[%c0_16, %c0_17, %c0_18] : memref<1x1x8xf32, #tpu.memory_space<vmem>>, vector<1x1x8xf32>
    %18 = vector.shape_cast %17 : vector<1x1x8xf32> to vector<1x8xf32>
    %19 = vector.broadcast %18 : vector<1x8xf32> to vector<8x8xf32>
    %20 = arith.addf %16, %19 : vector<8x8xf32>
    %c0_19 = arith.constant 0 : index
    %c0_20 = arith.constant 0 : index
    %c0_21 = arith.constant 0 : index
    %21 = vector.load %arg4[%c0_19, %c0_20, %c0_21] : memref<1x8x32xbf16, #tpu.memory_space<vmem>>, vector<1x8x32xbf16>
    %22 = vector.shape_cast %21 : vector<1x8x32xbf16> to vector<8x32xbf16>
    %c0_22 = arith.constant 0 : index
    %c0_23 = arith.constant 0 : index
    %c0_24 = arith.constant 0 : index
    %23 = vector.load %arg9[%c0_22, %c0_23, %c0_24] : memref<1x32x8xbf16, #tpu.memory_space<vmem>>, vector<1x32x8xbf16>
    %24 = vector.shape_cast %23 : vector<1x32x8xbf16> to vector<32x8xbf16>
    %cst_25 = arith.constant dense<0.000000e+00> : vector<8x8xf32>
    %25 = tpu.matmul %22, %24, %cst_25 {dimension_numbers = #tpu.dot_dimension_numbers<[1], [0], [0], [1], [0, 0, 1, 1], [], []>} : vector<8x32xbf16>, vector<32x8xbf16>, vector<8x8xf32> -> vector<8x8xf32>
    %c0_26 = arith.constant 0 : index
    %c0_27 = arith.constant 0 : index
    %c0_28 = arith.constant 0 : index
    %26 = vector.load %arg10[%c0_26, %c0_27, %c0_28] : memref<1x1x8xf32, #tpu.memory_space<vmem>>, vector<1x1x8xf32>
    %27 = vector.shape_cast %26 : vector<1x1x8xf32> to vector<1x8xf32>
    %28 = vector.broadcast %27 : vector<1x8xf32> to vector<8x8xf32>
    %29 = arith.addf %25, %28 : vector<8x8xf32>
    %30 = arith.truncf %11 : vector<8x8xf32> to vector<8x8xbf16>
    %31 = arith.truncf %20 : vector<8x8xf32> to vector<8x8xbf16>
    %cst_29 = arith.constant dense<0.000000e+00> : vector<8x8xf32>
    %32 = tpu.matmul %30, %31, %cst_29 {dimension_numbers = #tpu.dot_dimension_numbers<[1], [1], [0], [0], [0, 0, 1, 0], [], []>} : vector<8x8xbf16>, vector<8x8xbf16>, vector<8x8xf32> -> vector<8x8xf32>
    %cst_30 = arith.constant 0.353553385 : f32
    %33 = vector.broadcast %cst_30 : f32 to vector<8x8xf32>
    %34 = arith.mulf %32, %33 : vector<8x8xf32>
    %cst_31 = arith.constant dense<0xFF800000> : vector<8xf32>
    %35 = vector.multi_reduction <maximumf>, %34, %cst_31 [1] : vector<8x8xf32> to vector<8xf32>
    %36 = vector.shape_cast %35 : vector<8xf32> to vector<8x1xf32>
    %37 = vector.broadcast %36 : vector<8x1xf32> to vector<8x8xf32>
    %38 = arith.subf %34, %37 : vector<8x8xf32>
    %39 = math.exp %38 : vector<8x8xf32>
    %cst_32 = arith.constant dense<0.000000e+00> : vector<8xf32>
    %40 = vector.multi_reduction <add>, %39, %cst_32 [1] : vector<8x8xf32> to vector<8xf32>
    %41 = vector.shape_cast %40 : vector<8xf32> to vector<8x1xf32>
    %42 = tpu.reciprocal %41 {approx = true} : vector<8x1xf32> -> vector<8x1xf32>
    %43 = vector.broadcast %42 : vector<8x1xf32> to vector<8x8xf32>
    %44 = arith.mulf %39, %43 : vector<8x8xf32>
    %45 = arith.truncf %44 : vector<8x8xf32> to vector<8x8xbf16>
    %46 = arith.truncf %29 : vector<8x8xf32> to vector<8x8xbf16>
    %cst_33 = arith.constant dense<0.000000e+00> : vector<8x8xf32>
    %47 = tpu.matmul %45, %46, %cst_33 {dimension_numbers = #tpu.dot_dimension_numbers<[1], [0], [0], [1], [0, 0, 1, 1], [], []>} : vector<8x8xbf16>, vector<8x8xbf16>, vector<8x8xf32> -> vector<8x8xf32>
    %c0_34 = arith.constant 0 : index
    %c0_35 = arith.constant 0 : index
    %48 = vector.load %arg14[%c0_34, %c0_35] : memref<8x32xf32, #tpu.memory_space<vmem>>, vector<8x32xf32>
    %49 = arith.truncf %47 : vector<8x8xf32> to vector<8x8xbf16>
    %c0_36 = arith.constant 0 : index
    %c0_37 = arith.constant 0 : index
    %c0_38 = arith.constant 0 : index
    %50 = vector.load %arg11[%c0_36, %c0_37, %c0_38] : memref<1x8x32xbf16, #tpu.memory_space<vmem>>, vector<1x8x32xbf16>
    %51 = vector.shape_cast %50 : vector<1x8x32xbf16> to vector<8x32xbf16>
    %cst_39 = arith.constant dense<0.000000e+00> : vector<8x32xf32>
    %52 = tpu.matmul %49, %51, %cst_39 {dimension_numbers = #tpu.dot_dimension_numbers<[1], [0], [0], [1], [0, 0, 1, 1], [], []>} : vector<8x8xbf16>, vector<8x32xbf16>, vector<8x32xf32> -> vector<8x32xf32>
    %53 = arith.addf %48, %52 : vector<8x32xf32>
    %c0_40 = arith.constant 0 : index
    %c0_41 = arith.constant 0 : index
    %54 = vector.load %arg14[%c0_40, %c0_41] : memref<8x32xf32, #tpu.memory_space<vmem>>, vector<8x32xf32>
    tpu.vector_store %arg14[%c0_40, %c0_41], %53 {strides = array<i32>} : memref<8x32xf32, #tpu.memory_space<vmem>>, vector<8x32xf32>,
    %c3_i32 = arith.constant 3 : i32
    %55 = arith.cmpi eq, %arg1, %c3_i32 : i32
    %56 = arith.extui %55 : i1 to i32
    %c0_i32_42 = arith.constant 0 : i32
    %57 = arith.cmpi ne, %56, %c0_i32_42 : i32
    scf.if %57 {
      %c0_43 = arith.constant 0 : index
      %c0_44 = arith.constant 0 : index
      %58 = vector.load %arg14[%c0_43, %c0_44] : memref<8x32xf32, #tpu.memory_space<vmem>>, vector<8x32xf32>
      %c0_45 = arith.constant 0 : index
      %c0_46 = arith.constant 0 : index
      %59 = vector.load %arg12[%c0_45, %c0_46] : memref<1x32xf32, #tpu.memory_space<vmem>>, vector<1x32xf32>
      %60 = vector.broadcast %59 : vector<1x32xf32> to vector<8x32xf32>
      %61 = arith.addf %58, %60 : vector<8x32xf32>
      %c0_47 = arith.constant 0 : index
      %c0_48 = arith.constant 0 : index
      %c0_49 = arith.constant 0 : index
      %62 = vector.load %arg13[%c0_47, %c0_48, %c0_49] : memref<1x8x32xf32, #tpu.memory_space<vmem>>, vector<1x8x32xf32>
      %63 = vector.shape_cast %62 : vector<1x8x32xf32> to vector<8x32xf32>
      %64 = vector.shape_cast %61 : vector<8x32xf32> to vector<1x8x32xf32>
      tpu.vector_store %arg13[%c0_47, %c0_48, %c0_49], %64 {strides = array<i32>} : memref<1x8x32xf32, #tpu.memory_space<vmem>>, vector<1x8x32xf32>,
    } else {
    }
    return
  }
  func.func @transform_0(%arg0: i32, %arg1: i32) -> (i32, i32, i32) {
    %c0_i32 = arith.constant 0 : i32
    %c0_i32_0 = arith.constant 0 : i32
    %c0_i32_1 = arith.constant 0 : i32
    return %arg0, %c0_i32, %c0_i32_0 : i32, i32, i32
  }
  func.func @transform_1(%arg0: i32, %arg1: i32) -> (i32, i32, i32) {
    %c0_i32 = arith.constant 0 : i32
    %c0_i32_0 = arith.constant 0 : i32
    %c0_i32_1 = arith.constant 0 : i32
    return %arg0, %c0_i32, %c0_i32_0 : i32, i32, i32
  }
  func.func @transform_2(%arg0: i32, %arg1: i32) -> (i32, i32, i32) {
    %c0_i32 = arith.constant 0 : i32
    %c0_i32_0 = arith.constant 0 : i32
    %c0_i32_1 = arith.constant 0 : i32
    return %arg0, %c0_i32, %c0_i32_0 : i32, i32, i32
  }
  func.func @transform_3(%arg0: i32, %arg1: i32) -> (i32, i32, i32) {
    %c0_i32 = arith.constant 0 : i32
    %c0_i32_0 = arith.constant 0 : i32
    %c0_i32_1 = arith.constant 0 : i32
    return %arg1, %c0_i32, %c0_i32_0 : i32, i32, i32
  }
  func.func @transform_4(%arg0: i32, %arg1: i32) -> (i32, i32, i32) {
    %c0_i32 = arith.constant 0 : i32
    %c0_i32_0 = arith.constant 0 : i32
    %c0_i32_1 = arith.constant 0 : i32
    return %arg1, %c0_i32, %c0_i32_0 : i32, i32, i32
  }
  func.func @transform_5(%arg0: i32, %arg1: i32) -> (i32, i32, i32) {
    %c0_i32 = arith.constant 0 : i32
    %c0_i32_0 = arith.constant 0 : i32
    %c0_i32_1 = arith.constant 0 : i32
    return %arg1, %c0_i32, %c0_i32_0 : i32, i32, i32
  }
  func.func @transform_6(%arg0: i32, %arg1: i32) -> (i32, i32, i32) {
    %c0_i32 = arith.constant 0 : i32
    %c0_i32_0 = arith.constant 0 : i32
    %c0_i32_1 = arith.constant 0 : i32
    return %arg1, %c0_i32, %c0_i32_0 : i32, i32, i32
  }
  func.func @transform_7(%arg0: i32, %arg1: i32) -> (i32, i32, i32) {
    %c0_i32 = arith.constant 0 : i32
    %c0_i32_0 = arith.constant 0 : i32
    %c0_i32_1 = arith.constant 0 : i32
    return %arg1, %c0_i32, %c0_i32_0 : i32, i32, i32
  }
  func.func @transform_8(%arg0: i32, %arg1: i32) -> (i32, i32, i32) {
    %c0_i32 = arith.constant 0 : i32
    %c0_i32_0 = arith.constant 0 : i32
    %c0_i32_1 = arith.constant 0 : i32
    return %arg1, %c0_i32, %c0_i32_0 : i32, i32, i32
  }
  func.func @transform_9(%arg0: i32, %arg1: i32) -> (i32, i32, i32) {
    %c0_i32 = arith.constant 0 : i32
    %c0_i32_0 = arith.constant 0 : i32
    %c0_i32_1 = arith.constant 0 : i32
    return %arg1, %c0_i32, %c0_i32_0 : i32, i32, i32
  }
  func.func @transform_10(%arg0: i32, %arg1: i32) -> (i32, i32) {
    %c0_i32 = arith.constant 0 : i32
    %c0_i32_0 = arith.constant 0 : i32
    %c0_i32_1 = arith.constant 0 : i32
    return %c0_i32, %c0_i32_0 : i32, i32
  }
  func.func @transform_11(%arg0: i32, %arg1: i32) -> (i32, i32, i32) {
    %c0_i32 = arith.constant 0 : i32
    %c0_i32_0 = arith.constant 0 : i32
    %c0_i32_1 = arith.constant 0 : i32
    return %arg0, %c0_i32, %c0_i32_0 : i32, i32, i32
  }
}

</mosaic_0001>

<bundles_post_ra>
// kernel: tpu_custom_call.1
= control target key start
LH: loop header
LB: loop body
LE: loop exit
PB: predicated region body
PF: predicated region fallthrough
CT: control target
= control target key end

     0   :  { %s1442_s0 = inlined_call_operand.vmem [shape: bf16[2,8,32], index: 0, kind: input, shape index: {}]   ;;  %s1443_s1 = inlined_call_operand.vmem [shape: bf16[2,8,32], index: 1, kind: input, shape index: {}]   ;;  %s1444_s2 = inlined_call_operand.vmem [shape: bf16[2,8,32], index: 2, kind: input, shape index: {}]   ;;  %s1445_s3 = inlined_call_operand.vmem [shape: bf16[4,32,8], index: 3, kind: input, shape index: {}]   ;;  %s1446_s4 = inlined_call_operand.vmem [shape: f32[4,1,8], index: 4, kind: input, shape index: {}]   ;;  %s1447_s5 = inlined_call_operand.vmem [shape: bf16[4,32,8], index: 5, kind: input, shape index: {}]   ;;  %s1448_s6 = inlined_call_operand.vmem [shape: f32[4,1,8], index: 6, kind: input, shape index: {}]   ;;  %s1449_s7 = inlined_call_operand.vmem [shape: bf16[4,32,8], index: 7, kind: input, shape index: {}]   ;;  %s1450_s8 = inlined_call_operand.vmem [shape: f32[4,1,8], index: 8, kind: input, shape index: {}]   ;;  %s1451_s9 = inlined_call_operand.vmem [shape: bf16[4,8,32], index: 9, kind: input, shape index: {}]   ;;  %s1452_s10 = inlined_call_operand.vmem [shape: f32[1,32], index: 10, kind: input, shape index: {}]   ;;  %s1453_s11 = inlined_call_operand.hbm [shape: f32[2,8,32], index: 11, kind: output, shape index: {}]  }
   0x1   :  { %1468 = sst [smem:[#allocation18_spill]] %s1442_s0 }
   0x2   :  { %1469 = sst [smem:[#allocation19_spill]] %s1443_s1 }
   0x3   :  { %1470 = sst [smem:[#allocation20_spill]] %s1445_s3 }
   0x4   :  { %1471 = sst [smem:[#allocation21_spill]] %s1446_s4 }
   0x5   :  { %1472 = sst [smem:[#allocation22_spill]] %s1452_s10 }
   0x6   :  { %1473 = sst [smem:[#allocation23_spill]] %s1453_s11 }
   0x7   :  { %16 = vsyncpa [#allocation4], 0 }
   0x8   :  { %18 = vsyncpa [#allocation4 + $0x1], 0  ;;  %s1240_s17 = smov 0   ;;  %s1242_s18 = smov 0  }
   0x9   :  { %s1244_s19 = smov 0   ;;  %s1246_s20 = smov 0  }
   0xa   :  { %s1248_s21 = smov 0   ;;  %s1250_s22 = smov 0  }
   0xb   :  { %s1252_s23 = smov 0   ;;  %s1254_s24 = smov 0  }
   0xc LB: > { %1474 = sst [smem:[#allocation6_spill]] %s1149_s17  ;;  %s942_s25 = sadd.s32 4294967295, %s1177_s24   ;;  %s1177_s24 = sphi %s1254_s24, %s24_s24   ;;  %s1173_s23 = sphi %s1252_s23, %s1509_s23   ;;  %s1169_s22 = sphi %s1250_s22, %s1508_s22   ;;  %s1165_s21 = sphi %s1248_s21, %s1507_s21   ;;  %s1161_s20 = sphi %s1246_s20, %s1506_s20   ;;  %s1157_s19 = sphi %s1244_s19, %s1505_s19   ;;  %s1153_s18 = sphi %s1242_s18, %s1504_s18   ;;  %s1149_s17 = sphi %s1240_s17, %s1503_s17  }
   0xd   : > { %1475 = sst [smem:[#allocation7_spill]] %s1153_s18  ;;  %s943_s26 = sadd.s32 4294967294, %s1177_s24  }
   0xe   : > { %1476 = sst [smem:[#allocation8_spill]] %s1157_s19  ;;  %s33_s27 = sadd.s32 1, %s1169_s22 }
   0xf   : > { %1477 = sst [smem:[#allocation9_spill]] %s1165_s21  ;;  %p34_p0 = scmp.ge.s32.totalorder %s33_s27, 4 }
  0x10   : > { %1478 = sst [smem:[#allocation10_spill]] %s1169_s22  ;;  %s36_s28 = sadd.s32 1, %s1173_s23 }
  0x11   : > { %1479 = sst [smem:[#allocation11_spill]] %s1173_s23  ;;  %p334_p1 = scmp.ne.s32.totalorder %s1157_s19, %s1153_s18 }
  0x12   : > { %1480 = sst [smem:[#allocation12_spill]] %s1177_s24  ;;  %p335_p2 = scmp.eq.s32.totalorder %s942_s25, 7 }
  0x13   : > { %s1511_s27 = smov (%p34_p0, %s33_s27), 0  ;;  %s1513_s28 = smov (!%p34_p0, %s36_s28), %s1173_s23 }
  0x14   : > { %1481 = sst [smem:[#allocation13_spill]] %s1511_s27  ;;  %p1289_p3 = por %p335_p2, %p334_p1 }
  0x15   : > { %p340_p4 = scmp.ne.s32.totalorder %s1153_s18, %s1149_s17  ;;  %p38_p5 = scmp.ge.s32.totalorder %s1513_s28, 2 }
  0x16   : > { %s1482_s29 = scalar_select %p1289_p3, 1, 0 }
  0x17   : > { %p341_p6 = scmp.eq.s32.totalorder %s943_s26, 7  ;;  %p946_p7 = scmp.ge.s32.totalorder %s1177_s24, 1 }
  0x18   : > { %1483 = sst [smem:[#allocation14_spill]] %s1482_s29  ;;  %p432_p8 = scmp.lt.s32.totalorder %s1177_s24, 9 }
  0x19   : > { %s1515_s28 = smov (%p38_p5, %s1513_s28), 0  ;;  %p1299_p9 = por %p341_p6, %p340_p4 }
  0x1a   : > { %1484 = sst [smem:[#allocation15_spill]] %s1515_s28  ;;  %p433_p10 = pnand %p946_p7, %p432_p8 }
  0x1b   : > { %s1485_s30 = scalar_select %p1299_p9, 1, 0 }
  0x1c   : > { %s321_s12 = ssub.s32 %s1173_s23, %s1515_s28  ;;  %s324_s13 = sadd.s32 1, %s1157_s19 }
  0x1d   : > { %1486 = sst [smem:[#allocation16_spill]] %s1485_s30  ;;  %p322_p11 = scmp.eq.s32.totalorder %s321_s12, 0 }
  0x1e   : > { %436 = sbr.rel (%p433_p10) target bundleno = 875 (0x36b), region = 64  ;;  %s1455_s15 = sand.u32 (!%p433_p10), 1, %s1153_s18  }
  0x1f   : > { %s1307_s14 = scalar_select %p322_p11, %s1157_s19, %s324_s13  }
  0x20   : > { %p507_p12 = scmp.lt.s32.totalorder (!%p433_p10), %s1165_s21, 1  ;;  %s1313_s16 = sshll.u32 (!%p433_p10), %s1455_s15, 3 }
  0x21   : > { %1487 = sst [smem:[#allocation17_spill]] %s1307_s14  ;;  %p519_p13 = scmp.lt.s32.totalorder (!%p433_p10), %s1161_s20, 3 }
  0x22   : > { %s1488_s0 = sld [smem:[#allocation18_spill]] (!%p433_p10)  ;;  %p958_p0 = scmp.ne.s32.totalorder (!%p433_p10), %s1161_s20, 0 }
  0x23   : > { %s508_s25 = scalar_select %p507_p12, %s1165_s21, 1 }
  0x24   : > { %s1318_s26 = scalar_select %p519_p13, %s1161_s20, 3 }
  0x25   : > { %s1320_s12 = sshll.u32 %s508_s25, 2  ;;  %s1489_s1 = sld [smem:[#allocation19_spill]] }
  0x26   : > { %s994_s17 = sshll.u32 %s1318_s26, 4  ;;  %s1490_s3 = sld [smem:[#allocation20_spill]] }
  0x27   : > { %s1491_s4 = sld [smem:[#allocation21_spill]]  ;;  %s534_s27 = scalar_lea.vmem %s1448_s6, %s1318_s26 }
  0x28   : > { %s510_s15 = scalar_lea.vmem %s1488_s0, %s1320_s12  ;;  %s531_s0 = scalar_lea.vmem %s1447_s5, %s994_s17 }
  0x29   : > { %s1352_s14 = scalar_lea.vmem %s1449_s7, %s994_s17  ;;  %s542_s24 = scalar_lea.vmem %s1450_s8, %s1318_s26 }
  0x2a   : > { %s506_s21 = scalar_lea.vmem [#allocation3], %s1313_s16  ;;  %551 = sbr.rel (%p958_p0) target bundleno = 49 (0x31), region = 68 }
  0x2b   : > { %s514_s22 = scalar_lea.vmem %s1489_s1, %s1320_s12 }
  0x2c   : > { %s523_s25 = scalar_lea.vmem %s1490_s3, %s994_s17  ;;  %s957_s3 = sshll.u32 %s1318_s26, 2 }
  0x2d   : > { %s526_s28 = scalar_lea.vmem %s1491_s4, %s1318_s26  ;;  %s1362_s4 = scalar_lea.vmem %s1451_s9, %s957_s3 }
  0x2f   : > { %vm552_vm0 = vcmask 261120   ;;  %v1179_v0 = vmov 0.0  }
  0x30   : > { %553 = vst.msk [vmem:[#allocation2] sm:$0xff] %vm552_vm0, %v1179_v0 }
  0x31 PF: > { %v998_v1 = vld [vmem:[%s523_s25 + $0x8] sm:$0xff]  ;;  %v997_v3 = vld [vmem:[%s523_s25] sm:$0xff]  ;;  %vm575_vm1 = vcmask 261120   ;;  %vm668_vm2 = vcmask 64512   ;;  %s1492_s3 = scalar_lea.vmem %s1444_s2, %s1320_s12  ;;  %vm705_vm3 = vcmask 1043456   ;;  %p989_p1 = scmp.ne.s32.totalorder %s1161_s20, 3 }
  0x32   : > { %v1000_v2 = vld [vmem:[%s531_s0 + $0x8] sm:$0xff]  ;;  %585 = vmatpush.bf16.msra.mxu0 %v998_v1  ;;  %v999_v4 = vld [vmem:[%s531_s0] sm:$0xff]  ;;  %s1493_s30 = sld [smem:[#allocation22_spill]] (!%p989_p1) }
  0x33   : > { %622 = vmatpush.bf16.msra.mxu1 %v1000_v2  ;;  %v554_v5 = vld [vmem:[%s510_s15] sm:$0xf]  ;;  %v1002_v18 = vld [vmem:[%s1352_s14 + $0x8] sm:$0xff] }
  0x34   : > { %v592_v6 = vld [vmem:[%s514_s22] sm:$0xf]  ;;  %659 = vmatpush.bf16.msra.mxu2 %v1002_v18 }
  0x35   : > { %v1076_v7 = vld [vmem:[%s534_s27] ss:$0 sm:$0xff] }
  0x36   : > { %586 = vmatpush.bf16.msra.mxu0 %v997_v3  ;;  %v1075_v10 = vld [vmem:[%s526_s28] ss:$0 sm:$0xff] }
  0x37   : > { %623 = vmatpush.bf16.msra.mxu1 %v999_v4  ;;  %v1001_v19 = vld [vmem:[%s1352_s14] sm:$0xff] }
  0x38   : > { %660 = vmatpush.bf16.msra.mxu2 %v1001_v19  ;;  %v629_v20 = vld [vmem:[%s1492_s3] sm:$0xf] }
  0x39   : > { %967 = vmatmul.msk.bf16.vlgmr.msra.gmra.mxu0 %vm575_vm1, %v554_v5  ;;  %v1077_v25 = vld [vmem:[%s542_s24] ss:$0 sm:$0xff] }
  0x3a   : > { %976 = vmatmul.msk.bf16.vlgmr.msra.gmra.mxu1 %vm575_vm1, %v592_v6  ;;  %v724_v36 = vld [vmem:[%s1362_s4] sm:$0xf] }
  0x3b   : > { %985 = vmatmul.msk.bf16.vlgmr.msra.gmra.mxu2 %vm575_vm1, %v629_v20  ;;  %v729_v37 = vsel %vm705_vm3, %v724_v36, 0  ;;  %v722_v45 = vld [vmem:[#allocation2] sm:$0xff] }
  0x3c   : > { %738 = vmatpush.bf16.msrb.mxu1 %v729_v37 }
  0xb6   : > { %v588_v8 = vpop.f32.mrf.mxu0 }
  0xb7   : > { %v625_v9 = vpop.f32.mrf.mxu1  ;;  %v589_v13 = vadd.f32 %v1075_v10, %v588_v8 }
  0xb8   : > { %v626_v11 = vadd.f32 %v1076_v7, %v625_v9 }
  0xb9   : > { %v666_v17 = vpack.c.bf16 %v589_v13, %v589_v13 }
  0xba   : > { %v667_v12 = vpack.c.bf16 %v626_v11, %v626_v11 }
  0xbc   : > { %v673_v14 = vsel %vm668_vm2, %v667_v12, 0 }
  0xbd   : > { %682 = vmatpush.bf16.xpose.msra.mxu3 %v673_v14 }
  0xbe   : > { %v590_v15 = vpop.f32.mrf.mxu0  ;;  %v662_v26 = vpop.f32.mrf.mxu2 }
  0xbf   : > { %v627_v16 = vpop.f32.mrf.mxu1  ;;  %v663_v27 = vadd.f32 %v1077_v25, %v662_v26 }
  0xc1   : > { %v701_v29 = vpack.c.bf16 %v663_v27, %v663_v27 }
  0xc3   : > { %v707_v31 = vsel %vm705_vm3, %v701_v29, 0 }
  0xc4   : > { %986 = vmatmul.msk.bf16.vlgmr.msra.gmra.mxu3 %vm668_vm2, %v666_v17  ;;  %716 = vmatpush.bf16.msrb.mxu0 %v707_v31 }
  0xc6   : > { %v664_v33 = vpop.f32.mrf.mxu2 }
 0x147   : > { %v684_v21 = vpop.f32.mrf.mxu3 }
 0x148   : > { %v688_v22 = vmul.f32 0.35355338, %v684_v21 }
 0x14a   : > { %v689_v23 = vsel %vm668_vm2, %v688_v22, -inf }
 0x14b   : > { %690 = vmax.xlane.f32.xlu0 %v689_v23 }
 0x14f   : > { %v686_v24 = vpop.f32.mrf.mxu3 }
 0x1be   : > { %v691_v28 = vpop.xlane.xlu0 %690 }
 0x1bf   : > { %v692_v30 = vsub.f32 %v688_v22, %v691_v28 }
 0x1c1   : > { %v693_v32 = vmul.f32 1.442695, %v692_v30 }
 0x1c3   : > { %1078 = vpow2.f32 %v693_v32 }
 0x1c9   : > { %v1079_v34 = vpop.eup %1078 }
 0x1ca   : > { %v695_v35 = vsel %vm668_vm2, %v1079_v34, 0.0 }
 0x1cb   : > { %696 = vadd.xlane.f32.xlu0 %v695_v35 }
 0x23e   : > { %v697_v38 = vpop.xlane.xlu0 %696 }
 0x23f   : > { %1080 = vrcp.f32 %v697_v38 }
 0x245   : > { %v1081_v39 = vpop.eup %1080 }
 0x246   : > { %v699_v40 = vmul.f32 %v1081_v39, %v1079_v34 }
 0x248   : > { %v700_v41 = vpack.c.bf16 %v699_v40, %v699_v40 }
 0x24a   : > { %987 = vmatmul.msk.bf16.vlgmr.msrb.gmra.mxu0 %vm668_vm2, %v700_v41 }
 0x2c7   : > { %v718_v42 = vpop.f32.mrf.mxu0 }
 0x2c8   : > { %v723_v43 = vpack.c.bf16 %v718_v42, %v718_v42 }
 0x2ca   : > { %988 = vmatmul.msk.bf16.vlgmr.msrb.gmra.mxu1 %vm668_vm2, %v723_v43 }
 0x2cf   : > { %v720_v44 = vpop.f32.mrf.mxu0 }
 0x347   : > { %v740_v46 = vpop.f32.mrf.mxu1 }
 0x348   : > { %v744_v47 = vadd.f32 %v740_v46, %v722_v45 }
 0x34a   : > { %745 = vst.msk [vmem:[#allocation2] sm:$0xff] %vm575_vm1, %v744_v47 }
 0x34b   : > { %749 = sbr.rel (%p989_p1) target bundleno = 853 (0x355), region = 72 }
 0x34f   : > { %v742_v48 = vpop.f32.mrf.mxu1 }
 0x350   : > { %v1082_v50 = vld [vmem:[%s1493_s30] ss:$0 sm:$0xff] }
 0x351   : > { %v750_v49 = vld [vmem:[#allocation2] sm:$0xff] }
 0x352   : > { %v755_v51 = vadd.f32 %v1082_v50, %v750_v49 }
 0x354   : > { %756 = vst.msk [vmem:[%s506_s21] sm:$0xff] %vm575_vm1, %v755_v51 }
 0x355 PF: > { %s1494_s15 = sld [smem:[#allocation9_spill]]  ;;  %s770_s19 = sshll.u32 %s506_s21, 4  ;;  %s771_s19 = int_to_ptr.vmem [resolvable:$true] %s770_s19 }
 0x356   : > { %s1495_s26 = sld [smem:[#allocation7_spill]] }
 0x357   : > { %s1497_s20 = sld [smem:[#allocation23_spill]] }
 0x35b   : > { %s991_s25 = sshll.u32 %s1494_s15, 3 }
 0x35c   : > { %s1499_s11 = sand.u32 1, %s1495_s26  }
 0x35d   : > { %s1498_s27 = smov %s1497_s20  ;;  %s768_s23 = scalar_lea.hbm %s1497_s20, %s991_s25 }
 0x35e   : > { %s772_s14 = sshll.u32 %s768_s23, 4  ;;  %s758_s24 = scalar_lea.sflag [#allocation4], %s1499_s11  ;;  %s773_s14 = int_to_ptr.hbm [resolvable:$true] %s772_s14 }
 0x35f   : > { %s1097_s18 = sshra.s32 %s773_s14, 4  ;;  %s1103_s3 = scalar_lea.hbm %s1498_s27, 16  ;;  %s1098_s18 = int_to_ptr.hbm [resolvable:$true] %s1097_s18 }
 0x360   : > { %s1099_s29 = scalar_lea.hbm %s1098_s18, 8  ;;  %p1104_p6 = scmp.lt.s32.totalorder %s1098_s18, %s1498_s27 }
 0x361   : > { %p1100_p2 = scmp.ne.s32.totalorder %s1098_s18, %s1099_s29  ;;  %p1105_p7 = scmp.lt.s32.totalorder %s1103_s3, %s1099_s29 }
 0x363   : > { %p1101_p4 = pnand %p1100_p2, %p1289_p3  ;;  %p1106_p8 = por %p1105_p7, %p1104_p6 }
 0x365   : > { %p1102_p5 = pneg %p1101_p4 }
 0x367   : > { %p1107_p10 = pnand %p1106_p8, %p1102_p5 }
 0x369   : > { %1110 = shalt.err (!%p1107_p10)
}
 0x36a   : > { %1003 = dma.vmem_to_hbm [thread:$0]  (%p1289_p3), %s771_s19, 128, %s773_s14, %s758_s24  }
 0x36b PF: > { %s1500_s16 = sld [smem:[#allocation12_spill]] }
 0x36c   : > { %s1501_s21 = sld [smem:[#allocation6_spill]] }
 0x371   : > { %p1009_p11 = scmp.ge.s32.totalorder %s1500_s16, 2 }
 0x372   : > { %s784_s22 = sand.u32 1, %s1501_s21  }
 0x373   : > { %p1006_p12 = pnand %p1009_p11, %p1299_p9  ;;  %s785_s30 = scalar_lea.sflag [#allocation4], %s784_s22 }
 0x375   : > { %p1007_p13 = pneg %p1006_p12 }
 0x377   : > { %1144 = dma.done.wait (%p1007_p13), %s785_s30, 128  }
 0x378   : > { %1146 = vsyncadd (%p1007_p13), %s785_s30, 4294967168  ;;  %s24_s24 = sadd.s32 1, %s1500_s16   ;;  %s1503_s17 = sld [smem:[#allocation7_spill]] }
 0x379   : > { %p21_p0 = scmp.ge.s32.totalorder %s24_s24, 10   ;;  %s1504_s18 = sld [smem:[#allocation8_spill]] }
 0x37a   : > { %s1505_s19 = sld [smem:[#allocation17_spill]] }
 0x37b   : > { %s1506_s20 = sld [smem:[#allocation10_spill]]  ;;  %23 = sbr.rel (!%p21_p0) target bundleno = 12 (0xc), region = 134 }
 0x37c   : > { %s1507_s21 = sld [smem:[#allocation11_spill]] }
 0x37d   : > { %s1508_s22 = sld [smem:[#allocation13_spill]] }
 0x37e   : > { %s1509_s23 = sld [smem:[#allocation15_spill]] }
 0x380   :  { %791 = vsyncpa [#allocation4], 1 }
 0x381   :  { %793 = vsyncpa [#allocation4 + $0x1], 1 }

</bundles_post_ra>
